<compile_context>
chip_gen: v7x
topology: tpu7x:2x2x1
jax: 0.10.0
libtpu: 0.0.40
codegen_flags: <defaults>
</compile_context>

<pallas_src>
import jax
import jax.numpy as jnp
from jax.experimental import pallas as pl
from jax.experimental.pallas import tpu as pltpu


def _logreg_kernel(x_ref, w_ref, b_ref, o_ref):
    # x_ref: (TB, F)  VMEM tile of the input batch (streamed, double-buffered)
    # w_ref: (1, F)   VMEM lane-dense weight row (resident across grid steps)
    # b_ref: (1,)     SMEM scalar bias
    # o_ref: (1, TB)  VMEM lane-dense output tile (batch on lanes)
    x = x_ref[...]
    w = w_ref[...]
    # (1, F) contracted with (TB, F) over F -> (1, TB); batch lands on lanes.
    # Same last-dim/last-dim contraction pattern as flash-attention's
    # einsum('bqd,bkd->bqk', ...); runs on the MXU with f32 accumulation.
    z = jax.lax.dot_general(
        w, x,
        dimension_numbers=(((1,), (1,)), ((), ())),
        preferred_element_type=jnp.float32,
    )
    z = z + b_ref[0]
    o_ref[...] = jax.nn.sigmoid(z).astype(o_ref.dtype)


def logistic_regression(x, weight, bias, *, tb=None):
    """sigmoid(x @ weight.T + bias).

    x: (..., F); weight: (1, F) (PyTorch nn.Linear layout); bias: (1,).
    Returns (..., 1).
    """
    orig_lead = x.shape[:-1]
    F = x.shape[-1]
    x2 = x.reshape(-1, F)
    B = x2.shape[0]
    itemsize = jnp.dtype(x2.dtype).itemsize

    if tb is None:
        # Largest batch tile (multiple of 128 rows) whose double-buffered x
        # block stays under ~8 MiB -> safe within the scoped-VMEM defaults of
        # v5e (16 MiB), v6e (32 MiB) and v7x (32 MiB scoped / 64 MiB physical).
        # Cap at 4096 rows and don't over-pad tiny batches.
        budget_rows = (8 * 1024 * 1024) // (2 * max(F * itemsize, 1))
        tb_cap = max(128, min(4096, (budget_rows // 128) * 128))
        tb = min(tb_cap, ((B + 127) // 128) * 128)
    # Output block is (1, tb): keep tb a multiple of 128 (lane-dense stores).
    tb = max(128, (tb // 128) * 128)

    n_tiles = pl.cdiv(B, tb)
    b_pad = n_tiles * tb
    if b_pad != B:
        # Pad so every tile is full; padded rows are sliced off below.
        x2 = jnp.pad(x2, ((0, b_pad - B), (0, 0)))

    w_row = weight.reshape(1, F).astype(x2.dtype)   # lane-dense, VMEM-resident
    b_vec = bias.reshape(1).astype(jnp.float32)     # scalar -> SMEM

    cost = pl.CostEstimate(
        flops=2 * b_pad * F + b_pad,
        transcendentals=b_pad,
        bytes_accessed=b_pad * F * itemsize + F * itemsize + b_pad * itemsize,
    )

    out = pl.pallas_call(
        _logreg_kernel,
        out_shape=jax.ShapeDtypeStruct((1, b_pad), x2.dtype),
        grid=(n_tiles,),
        in_specs=[
            pl.BlockSpec((tb, F), lambda i: (i, 0)),             # stream x tiles
            pl.BlockSpec((1, F), lambda i: (0, 0)),              # weight resident
            pl.BlockSpec(memory_space=pltpu.MemorySpace.SMEM),   # bias scalar
        ],
        out_specs=pl.BlockSpec((1, tb), lambda i: (0, i)),       # lane-dense slab
        compiler_params=pltpu.CompilerParams(
            dimension_semantics=("parallel",),   # independent batch tiles
        ),
        cost_estimate=cost,
    )(x2, w_row, b_vec)

    # (1, Bpad) -> (Bpad, 1) is a contiguous (metadata-only) reshape.
    y = out.reshape(b_pad, 1)[:B]
    return y.reshape(*orig_lead, 1)


if __name__ == "__main__":
    key = jax.random.PRNGKey(0)
    n_input_features = 32
    batch = 8

    kx, kw, kb = jax.random.split(key, 3)
    x = jax.random.normal(kx, (batch, n_input_features), dtype=jnp.float32)

    # Deterministic parameter init mimicking nn.Linear's uniform(-1/sqrt(F), 1/sqrt(F))
    bound = 1.0 / jnp.sqrt(jnp.float32(n_input_features))
    weight = jax.random.uniform(
        kw, (1, n_input_features), minval=-bound, maxval=bound, dtype=jnp.float32
    )
    bias = jax.random.uniform(kb, (1,), minval=-bound, maxval=bound, dtype=jnp.float32)

    y = logistic_regression(x, weight, bias)
    jax.block_until_ready(y)

    # Reference check (pure JAX, exact f32 VPU reduce).  The kernel's MXU f32
    # path may round operands to bf16 passes, so allow a small tolerance.
    z_ref = jnp.sum(x * weight[0], axis=-1, keepdims=True) + bias
    y_ref = jax.nn.sigmoid(z_ref)
    assert y.shape == (batch, 1)
    assert jnp.allclose(y, y_ref, atol=5e-3), "mismatch vs reference"

    print("KERNEL_OK")
</pallas_src>

<mosaic_0001>
module attributes {stable_mosaic.version = 11 : i64} {
  func.func @_logreg_kernel(%arg0: i32, %arg1: memref<128x32xf32, #tpu.memory_space<vmem>>, %arg2: memref<1x32xf32, #tpu.memory_space<vmem>>, %arg3: memref<1xf32, #tpu.memory_space<smem>>, %arg4: memref<1x128xf32, #tpu.memory_space<vmem>>) attributes {dimension_semantics = [#tpu.dimension_semantics<parallel>], iteration_bounds = array<i64: 1>, scalar_prefetch = 0 : i64, scratch_operands = 0 : i64, tpu.core_type = #tpu.core_type<tc>, window_params = [{transform_indices = @transform_0, window_bounds = array<i64: 128, 32>}, {pipeline_mode = #tpu.pipeline_mode<synchronous>, transform_indices = @transform_1, window_bounds = array<i64: 1, 32>}, {transform_indices = @transform_2, window_bounds = array<i64: 1>}, {transform_indices = @transform_3, window_bounds = array<i64: 1, 128>}]} {
    %c0 = arith.constant 0 : index
    %c0_0 = arith.constant 0 : index
    %0 = vector.load %arg1[%c0, %c0_0] : memref<128x32xf32, #tpu.memory_space<vmem>>, vector<128x32xf32>
    %c0_1 = arith.constant 0 : index
    %c0_2 = arith.constant 0 : index
    %1 = vector.load %arg2[%c0_1, %c0_2] : memref<1x32xf32, #tpu.memory_space<vmem>>, vector<1x32xf32>
    %cst = arith.constant dense<0.000000e+00> : vector<1x128xf32>
    %2 = tpu.matmul %1, %0, %cst {dimension_numbers = #tpu.dot_dimension_numbers<[1], [1], [0], [0], [0, 0, 1, 0], [], []>} : vector<1x32xf32>, vector<128x32xf32>, vector<1x128xf32> -> vector<1x128xf32>
    %c0_3 = arith.constant 0 : index
    %3 = memref.load %arg3[%c0_3] : memref<1xf32, #tpu.memory_space<smem>>
    %4 = vector.broadcast %3 : f32 to vector<1x128xf32>
    %5 = arith.addf %2, %4 : vector<1x128xf32>
    %6 = arith.negf %5 : vector<1x128xf32>
    %7 = math.exp %6 : vector<1x128xf32>
    %cst_4 = arith.constant 1.000000e+00 : f32
    %8 = vector.broadcast %cst_4 : f32 to vector<1x128xf32>
    %9 = arith.addf %8, %7 : vector<1x128xf32>
    %10 = arith.divf %8, %9 : vector<1x128xf32>
    %c0_5 = arith.constant 0 : index
    %c0_6 = arith.constant 0 : index
    %11 = vector.load %arg4[%c0_5, %c0_6] : memref<1x128xf32, #tpu.memory_space<vmem>>, vector<1x128xf32>
    tpu.vector_store %arg4[%c0_5, %c0_6], %10 {strides = array<i32>} : memref<1x128xf32, #tpu.memory_space<vmem>>, vector<1x128xf32>,
    return
  }
  func.func @transform_0(%arg0: i32) -> (i32, i32) {
    %c0_i32 = arith.constant 0 : i32
    %c0_i32_0 = arith.constant 0 : i32
    return %arg0, %c0_i32 : i32, i32
  }
  func.func @transform_1(%arg0: i32) -> (i32, i32) {
    %c0_i32 = arith.constant 0 : i32
    %c0_i32_0 = arith.constant 0 : i32
    %c0_i32_1 = arith.constant 0 : i32
    return %c0_i32, %c0_i32_0 : i32, i32
  }
  func.func @transform_2(%arg0: i32) -> i32 {
    %c0_i32 = arith.constant 0 : i32
    %c0_i32_0 = arith.constant 0 : i32
    return %c0_i32 : i32
  }
  func.func @transform_3(%arg0: i32) -> (i32, i32) {
    %c0_i32 = arith.constant 0 : i32
    %c0_i32_0 = arith.constant 0 : i32
    return %c0_i32, %arg0 : i32, i32
  }
}

</mosaic_0001>

<bundles_post_ra>
// kernel: tpu_custom_call.1
= control target key start
LH: loop header
LB: loop body
LE: loop exit
PB: predicated region body
PF: predicated region fallthrough
CT: control target
= control target key end

     0   :  { %vm35_vm0 = vcmask 261120   ;;  %v312_v2 = vmov 0.0|0.0   ;;  %vm313_vm2 = vmmov 0   ;;  %v314_v5 = vmov 0.0   ;;  %s425_s0 = inlined_call_operand.vmem [shape: f32[128,32], index: 0, kind: input, shape index: {}]   ;;  %s426_s1 = inlined_call_operand.vmem [shape: f32[1,32], index: 1, kind: input, shape index: {}]   ;;  %s427_s2 = inlined_call_operand.<no memory space> [shape: f32[1], index: 2, kind: input, shape index: {}]   ;;  %s428_s3 = inlined_call_operand.hbm [shape: f32[1,128], index: 3, kind: output, shape index: {}]  }
   0x1   :  { %v16_v0 = vld [vmem:[%s425_s0] sm:$0xff]  ;;  %v17_v1 = vld [vmem:[%s425_s0 + $0x8] sm:$0xff]  ;;  %248 = vmatprep.subr.bf16.mxu0 %v312_v2  ;;  %vm344_vm1 = vmpackc.low %vm35_vm0, %vm35_vm0  ;;  %245 = vmatprep.mubr.msk.f32.mxu0 %vm313_vm2, %v314_v5 }
   0x2   :  { %v249_v3 = vpack.c.bf16 %v17_v1, %v16_v0  ;;  %v18_v6 = vld [vmem:[%s425_s0 + $0x10] sm:$0xff]  ;;  %v19_v7 = vld [vmem:[%s425_s0 + $0x18] sm:$0xff] }
   0x4   :  { %251 = vmatpush3.bf16.xpose.msk.msra.mxu0 %vm344_vm1, %v249_v3 }
   0x5   :  { %252 = vmatprep.subr.bf16.mxu0 %v312_v2 }
   0x6   :  { %9 = vsyncpa [#allocation4], 0  ;;  %v253_v8 = vpack.c.bf16 %v19_v7, %v18_v6  ;;  %v20_v9 = vld [vmem:[%s425_s0 + $0x20] sm:$0xff]  ;;  %v21_v10 = vld [vmem:[%s425_s0 + $0x28] sm:$0xff]  ;;  %v34_v28 = vstv %s427_s2 }
   0x7   :  { %v257_v11 = vpack.c.bf16 %v21_v10, %v20_v9  ;;  %v22_v12 = vld [vmem:[%s425_s0 + $0x30] sm:$0xff]  ;;  %v23_v13 = vld [vmem:[%s425_s0 + $0x38] sm:$0xff]  ;;  %v24_v15 = vld [vmem:[%s425_s0 + $0x40] sm:$0xff] }
   0x8   :  { %v261_v14 = vpack.c.bf16 %v23_v13, %v22_v12  ;;  %v25_v16 = vld [vmem:[%s425_s0 + $0x48] sm:$0xff]  ;;  %v26_v18 = vld [vmem:[%s425_s0 + $0x50] sm:$0xff]  ;;  %v27_v19 = vld [vmem:[%s425_s0 + $0x58] sm:$0xff] }
   0x9   :  { %v265_v17 = vpack.c.bf16 %v25_v16, %v24_v15  ;;  %v269_v20 = vpack.c.bf16 %v27_v19, %v26_v18  ;;  %v28_v21 = vld [vmem:[%s425_s0 + $0x60] sm:$0xff]  ;;  %v29_v22 = vld [vmem:[%s425_s0 + $0x68] sm:$0xff]  ;;  %v30_v24 = vld [vmem:[%s425_s0 + $0x70] sm:$0xff] }
   0xa   :  { %v273_v23 = vpack.c.bf16 %v29_v22, %v28_v21  ;;  %v31_v25 = vld [vmem:[%s425_s0 + $0x78] sm:$0xff]  ;;  %v32_v27 = vld [vmem:[%s426_s1] sm:$0x1]  ;;  %s315_s0 = smov [#allocation3]  }
   0xb   :  { %v277_v26 = vpack.c.bf16 %v31_v25, %v30_v24  ;;  %s170_s21 = sshll.u32 %s315_s0, 4  ;;  %s171_s21 = int_to_ptr.vmem [resolvable:$true] %s170_s21 }
   0xc   :  { %255 = vmatpush3.bf16.xpose.msk.msra.mxu0 %vm344_vm1, %v253_v8  ;;  %s288_s1 = scalar_lea.vmem %s171_s21, 16  ;;  %s292_s22 = scalar_lea.vmem %s171_s21, 32 }
   0xd   :  { %256 = vmatprep.subr.bf16.mxu0 %v312_v2  ;;  %p289_p0 = scmp.ne.s32.totalorder %s171_s21, %s288_s1  ;;  %p293_p1 = scmp.lt.s32.totalorder %s171_s21, %s171_s21 }
   0xe   :  { %p294_p2 = scmp.lt.s32.totalorder %s292_s22, %s288_s1 }
  0x10   :  { %p295_p3 = por %p294_p2, %p293_p1 }
  0x12   :  { %p296_p4 = pnand %p295_p3, %p289_p0 }
  0x14   :  { %259 = vmatpush3.bf16.xpose.msk.msra.mxu0 %vm344_vm1, %v257_v11 }
  0x15   :  { %260 = vmatprep.subr.bf16.mxu0 %v312_v2 }
  0x1c   :  { %263 = vmatpush3.bf16.xpose.msk.msra.mxu0 %vm344_vm1, %v261_v14 }
  0x1d   :  { %264 = vmatprep.subr.bf16.mxu0 %v312_v2 }
  0x24   :  { %267 = vmatpush3.bf16.xpose.msk.msra.mxu0 %vm344_vm1, %v265_v17 }
  0x25   :  { %268 = vmatprep.subr.bf16.mxu0 %v312_v2 }
  0x2c   :  { %271 = vmatpush3.bf16.xpose.msk.msra.mxu0 %vm344_vm1, %v269_v20 }
  0x2d   :  { %272 = vmatprep.subr.bf16.mxu0 %v312_v2 }
  0x34   :  { %275 = vmatpush3.bf16.xpose.msk.msra.mxu0 %vm344_vm1, %v273_v23 }
  0x35   :  { %276 = vmatprep.subr.bf16.mxu0 %v312_v2 }
  0x3c   :  { %279 = vmatpush3.bf16.xpose.msk.msra.mxu0 %vm344_vm1, %v277_v26 }
  0x43   :  { %246 = vmatmul.mubr.msk.f32.vlgmr.msra.gmra.mrb[0].mxu0 %vm35_vm0, %v32_v27 }
 0x116   :  { %v153_v29 = vpop.f32.mrb[0].mxu0 }
 0x117   :  { %v154_v30 = vadd.f32 %v153_v29, %v34_v28  ;;  %v247_v31 = vpop.f32.mrb[1].mxu0 }
 0x119   :  { %v195_v32 = vmul.f32 -1.442695, %v154_v30 }
 0x11b   :  { %284 = vpow2.f32 %v195_v32 }
 0x125   :  { %v285_v33 = vpop.eup %284 }
 0x126   :  { %v160_v34 = vadd.f32 1.0, %v285_v33 }
 0x128   :  { %286 = vrcp.f32 %v160_v34 }
 0x132   :  { %v287_v35 = vpop.eup %286 }
 0x133   :  { %163 = vst [vmem:[#allocation3] sm:$0x1] %v287_v35 }
 0x134   :  { %299 = shalt.err (!%p296_p4)
}
 0x135   :  { %s300_s24 = scalar_lea.hbm %s428_s3, 16 }
 0x136   :  { %p301_p5 = scmp.ne.s32.totalorder %s428_s3, %s300_s24  ;;  %p304_p6 = scmp.lt.u32.totalorder %s300_s24, %s428_s3 }
 0x138   :  { %p306_p7 = pnand %p304_p6, %p301_p5 }
 0x13a   :  { %309 = shalt.err (!%p306_p7)
}
 0x13b   :  { %173 = dma.vmem_to_hbm [thread:$0]  %s171_s21, 16, %s428_s3, [#allocation4]  }
 0x13c   :  { %310 = dma.done.wait [#allocation4], 16  }
 0x13d   :  { %311 = vsyncadd [#allocation4], 4294967280 }
 0x13e   :  { %177 = vsyncpa [#allocation4], 1 }

</bundles_post_ra>
